<compile_context>
chip_gen: v7x
topology: tpu7x:2x2x1
jax: 0.10.0
libtpu: 0.0.40
codegen_flags: <defaults>
</compile_context>

<pallas_src>
import jax
import jax.numpy as jnp
from jax import lax
from jax.experimental import pallas as pl
from jax.experimental.pallas import tpu as pltpu

NUM_INPUTS = 784      # 1 * 28 * 28
NUM_OUTPUTS = 10
N_PAD = 128           # lane-dense padded output width
MAX_TB = 2048         # batch tile rows (f32 x tile ~7 MiB x2 buffers + out/W)
VMEM_LIMIT = 40 * 1024 * 1024


def _round_up(x, m):
    return (x + m - 1) // m * m


def _linear_kernel(x_ref, w_ref, b_ref, o_ref):
    # x_ref: (TB, K) f32, w_ref: (N_PAD, K) bf16, b_ref: (1, N_PAD) f32,
    # o_ref: (TB, N_PAD) bf16
    x = x_ref[...].astype(jnp.bfloat16)              # VPU cast, hidden under DMA
    acc = lax.dot_general(
        x, w_ref[...],
        dimension_numbers=(((1,), (1,)), ((), ())),  # x @ W.T on the MXU
        preferred_element_type=jnp.float32)
    o_ref[...] = (acc + b_ref[...]).astype(o_ref.dtype)


def linear_net_forward(x_batch, weight, bias):
    """Forward pass of LinearNet.

    Args:
      x_batch: (B, 1, 28, 28) float32 (NCHW, like the PyTorch module)
      weight:  (NUM_OUTPUTS, NUM_INPUTS) float32 (nn.Linear convention)
      bias:    (NUM_OUTPUTS,) float32
    Returns:
      (B, NUM_OUTPUTS) float32 logits
    """
    B = x_batch.shape[0]

    # Flatten (pure metadata reshape, no cast, no pad) -> streamed as f32.
    x_flat = x_batch.reshape(B, -1)                                # (B, 784) f32

    # Batch tile: full dim for tiny batches; otherwise a multiple of 16 rows
    # sized so there are >=2 grid steps (keeps both v7x TensorCores busy),
    # capped at MAX_TB.
    if B <= 16:
        TB = B
    else:
        TB = min(MAX_TB, _round_up(-(-B // 2), 16))
    grid = (pl.cdiv(B, TB),)                       # partial last block is OK:
                                                   # rows independent, tail sliced off

    # Lane-dense params: zero-pad the output dim 10 -> 128. Weight in bf16.
    w_pad = jnp.zeros((N_PAD, NUM_INPUTS), jnp.bfloat16)
    w_pad = w_pad.at[:NUM_OUTPUTS, :].set(weight.astype(jnp.bfloat16))
    b_pad = jnp.zeros((1, N_PAD), jnp.float32)
    b_pad = b_pad.at[0, :NUM_OUTPUTS].set(bias.astype(jnp.float32))

    cost = pl.CostEstimate(
        flops=2 * B * NUM_INPUTS * NUM_OUTPUTS,
        transcendentals=0,
        bytes_accessed=(B * NUM_INPUTS * 4           # x (f32, streamed)
                        + N_PAD * NUM_INPUTS * 2     # W  (bf16, resident)
                        + N_PAD * 4                  # bias (f32)
                        + B * N_PAD * 2))            # out (bf16)

    out = pl.pallas_call(
        _linear_kernel,
        out_shape=jax.ShapeDtypeStruct((B, N_PAD), jnp.bfloat16),
        grid_spec=pltpu.PrefetchScalarGridSpec(
            num_scalar_prefetch=0,
            grid=grid,
            in_specs=[
                pl.BlockSpec((TB, NUM_INPUTS), lambda i: (i, 0)),     # x tile (f32)
                pl.BlockSpec((N_PAD, NUM_INPUTS), lambda i: (0, 0)),  # W resident
                pl.BlockSpec((1, N_PAD), lambda i: (0, 0)),           # bias resident
            ],
            out_specs=pl.BlockSpec((TB, N_PAD), lambda i: (i, 0)),
        ),
        compiler_params=pltpu.CompilerParams(
            dimension_semantics=("parallel",),
            vmem_limit_bytes=VMEM_LIMIT),
        cost_estimate=cost,
    )(x_flat, w_pad, b_pad)

    # Slice away the lane padding of the output dim; return f32 logits
    # (tiny (B, 10) cast, fuses with the slice).
    return out[:, :NUM_OUTPUTS].astype(jnp.float32)


def init_params(key):
    """Deterministic init mimicking nn.Linear defaults (uniform +-1/sqrt(fan_in))."""
    k_w, k_b = jax.random.split(key)
    bound = 1.0 / jnp.sqrt(jnp.float32(NUM_INPUTS))
    weight = jax.random.uniform(
        k_w, (NUM_OUTPUTS, NUM_INPUTS), jnp.float32, minval=-bound, maxval=bound)
    bias = jax.random.uniform(
        k_b, (NUM_OUTPUTS,), jnp.float32, minval=-bound, maxval=bound)
    return weight, bias


if __name__ == "__main__":
    key = jax.random.PRNGKey(0)
    k_x, k_params = jax.random.split(key)

    batch = 8
    # Fashion-MNIST style input: (B, 1, 28, 28) NCHW -> flattens to 784.
    x = jax.random.normal(k_x, (batch, 1, 28, 28), jnp.float32)
    weight, bias = init_params(k_params)

    y = linear_net_forward(x, weight, bias)
    y = jax.block_until_ready(y)
    assert y.shape == (batch, NUM_OUTPUTS)
    assert y.dtype == jnp.float32

    # Reference with the same bf16 input/weight quantization (output is also
    # bf16-stored in the kernel, so tolerance covers one bf16 rounding step).
    x_bf = x.reshape(batch, -1).astype(jnp.bfloat16).astype(jnp.float32)
    w_bf = weight.astype(jnp.bfloat16).astype(jnp.float32)
    y_ref_bf16 = x_bf @ w_bf.T + bias
    assert jnp.allclose(y, y_ref_bf16, atol=3e-2, rtol=3e-2)

    # Full-f32 nn.Linear reference (loose tolerance, guards semantics).
    y_ref_f32 = x.reshape(batch, -1) @ weight.T + bias
    assert jnp.allclose(y, y_ref_f32, atol=6e-2, rtol=6e-2)

    print("KERNEL_OK")
</pallas_src>

<mosaic_0001>
module attributes {stable_mosaic.version = 11 : i64} {
  func.func @_linear_kernel(%arg0: i32, %arg1: memref<8x784xf32, #tpu.memory_space<vmem>>, %arg2: memref<128x784xbf16, #tpu.memory_space<vmem>>, %arg3: memref<1x128xf32, #tpu.memory_space<vmem>>, %arg4: memref<8x128xbf16, #tpu.memory_space<vmem>>) attributes {dimension_semantics = [#tpu.dimension_semantics<parallel>], iteration_bounds = array<i64: 1>, scalar_prefetch = 0 : i64, scratch_operands = 0 : i64, tpu.core_type = #tpu.core_type<tc>, window_params = [{transform_indices = @transform_0, window_bounds = array<i64: 8, 784>}, {pipeline_mode = #tpu.pipeline_mode<synchronous>, transform_indices = @transform_1, window_bounds = array<i64: 128, 784>}, {pipeline_mode = #tpu.pipeline_mode<synchronous>, transform_indices = @transform_2, window_bounds = array<i64: 1, 128>}, {transform_indices = @transform_3, window_bounds = array<i64: 8, 128>}]} {
    %c0 = arith.constant 0 : index
    %c0_0 = arith.constant 0 : index
    %0 = vector.load %arg1[%c0, %c0_0] : memref<8x784xf32, #tpu.memory_space<vmem>>, vector<8x784xf32>
    %1 = arith.truncf %0 : vector<8x784xf32> to vector<8x784xbf16>
    %c0_1 = arith.constant 0 : index
    %c0_2 = arith.constant 0 : index
    %2 = vector.load %arg2[%c0_1, %c0_2] : memref<128x784xbf16, #tpu.memory_space<vmem>>, vector<128x784xbf16>
    %cst = arith.constant dense<0.000000e+00> : vector<8x128xf32>
    %3 = tpu.matmul %1, %2, %cst {dimension_numbers = #tpu.dot_dimension_numbers<[1], [1], [0], [0], [0, 0, 1, 0], [], []>} : vector<8x784xbf16>, vector<128x784xbf16>, vector<8x128xf32> -> vector<8x128xf32>
    %c0_3 = arith.constant 0 : index
    %c0_4 = arith.constant 0 : index
    %4 = vector.load %arg3[%c0_3, %c0_4] : memref<1x128xf32, #tpu.memory_space<vmem>>, vector<1x128xf32>
    %5 = vector.broadcast %4 : vector<1x128xf32> to vector<8x128xf32>
    %6 = arith.addf %3, %5 : vector<8x128xf32>
    %7 = arith.truncf %6 : vector<8x128xf32> to vector<8x128xbf16>
    %c0_5 = arith.constant 0 : index
    %c0_6 = arith.constant 0 : index
    %8 = vector.load %arg4[%c0_5, %c0_6] : memref<8x128xbf16, #tpu.memory_space<vmem>>, vector<8x128xbf16>
    tpu.vector_store %arg4[%c0_5, %c0_6], %7 {strides = array<i32>} : memref<8x128xbf16, #tpu.memory_space<vmem>>, vector<8x128xbf16>,
    return
  }
  func.func @transform_0(%arg0: i32) -> (i32, i32) {
    %c0_i32 = arith.constant 0 : i32
    %c0_i32_0 = arith.constant 0 : i32
    return %arg0, %c0_i32 : i32, i32
  }
  func.func @transform_1(%arg0: i32) -> (i32, i32) {
    %c0_i32 = arith.constant 0 : i32
    %c0_i32_0 = arith.constant 0 : i32
    %c0_i32_1 = arith.constant 0 : i32
    return %c0_i32, %c0_i32_0 : i32, i32
  }
  func.func @transform_2(%arg0: i32) -> (i32, i32) {
    %c0_i32 = arith.constant 0 : i32
    %c0_i32_0 = arith.constant 0 : i32
    %c0_i32_1 = arith.constant 0 : i32
    return %c0_i32, %c0_i32_0 : i32, i32
  }
  func.func @transform_3(%arg0: i32) -> (i32, i32) {
    %c0_i32 = arith.constant 0 : i32
    %c0_i32_0 = arith.constant 0 : i32
    return %arg0, %c0_i32 : i32, i32
  }
}

</mosaic_0001>

<bundles_post_ra>
// kernel: tpu_custom_call.1
= control target key start
LH: loop header
LB: loop body
LE: loop exit
PB: predicated region body
PF: predicated region fallthrough
CT: control target
= control target key end

     0   :  { %s1034_s0 = inlined_call_operand.vmem [shape: f32[8,784], index: 0, kind: input, shape index: {}]   ;;  %s1035_s1 = inlined_call_operand.vmem [shape: bf16[128,784], index: 1, kind: input, shape index: {}]   ;;  %s1036_s2 = inlined_call_operand.vmem [shape: f32[1,128], index: 2, kind: input, shape index: {}]   ;;  %s1037_s3 = inlined_call_operand.hbm [shape: bf16[8,128], index: 3, kind: output, shape index: {}]  }
   0x1   :  { %v685_v0 = vld [vmem:[%s1035_s1 + $0x4] ss:$28 sps:$4 sm:$0xff]   ;;  %v687_v1 = vld [vmem:[%s1035_s1 + $0x14] ss:$28 sps:$4 sm:$0xff]   ;;  %v691_v4 = vld [vmem:[%s1035_s1 + $0x3c] ss:$28 sps:$4 sm:$0xff]  }
   0x2   :  { %409 = vmatprep.subr.bf16.mxu1 %v685_v0  ;;  %v689_v2 = vld [vmem:[%s1035_s1] ss:$28 sps:$4 sm:$0xff]   ;;  %v690_v3 = vld [vmem:[%s1035_s1 + $0x10] ss:$28 sps:$4 sm:$0xff]   ;;  %489 = vmatprep.subr.bf16.mxu0 %v687_v1  ;;  %v695_v6 = vld [vmem:[%s1035_s1 + $0x38] ss:$28 sps:$4 sm:$0xff]  }
   0x3   :  { %410 = vmatpush1.bf16.xpose.msra.mxu1 %v689_v2  ;;  %490 = vmatpush1.bf16.xpose.msra.mxu0 %v690_v3  ;;  %v693_v5 = vld [vmem:[%s1035_s1 + $0x4c] ss:$28 sps:$4 sm:$0xff]   ;;  %v697_v8 = vld [vmem:[%s1035_s1 + $0x74] ss:$28 sps:$4 sm:$0xff]   ;;  %v699_v9 = vld [vmem:[%s1035_s1 + $0x84] ss:$28 sps:$4 sm:$0xff]  }
   0x4   :  { %411 = vmatprep.subr.bf16.mxu1 %v691_v4  ;;  %491 = vmatprep.subr.bf16.mxu0 %v693_v5  ;;  %v696_v7 = vld [vmem:[%s1035_s1 + $0x48] ss:$28 sps:$4 sm:$0xff]   ;;  %v701_v10 = vld [vmem:[%s1035_s1 + $0x70] ss:$28 sps:$4 sm:$0xff]   ;;  %v702_v11 = vld [vmem:[%s1035_s1 + $0x80] ss:$28 sps:$4 sm:$0xff]  }
   0x5   :  { %v703_v12 = vld [vmem:[%s1035_s1 + $0xac] ss:$28 sps:$4 sm:$0xff]   ;;  %v705_v13 = vld [vmem:[%s1035_s1 + $0xbc] ss:$28 sps:$4 sm:$0xff]   ;;  %v709_v19 = vld [vmem:[%s1035_s1 + $0xe4] ss:$28 sps:$4 sm:$0xff]  }
   0x6   :  { %v17_v14 = vld [vmem:[%s1034_s0 + $0x8] sm:$0xff]  ;;  %v708_v17 = vld [vmem:[%s1035_s1 + $0xb8] ss:$28 sps:$4 sm:$0xff]   ;;  %v713_v22 = vld [vmem:[%s1035_s1 + $0xe0] ss:$28 sps:$4 sm:$0xff]  }
   0x7   :  { %v24_v15 = vpack.c.bf16 %v17_v14, %v17_v14  ;;  %v707_v16 = vld [vmem:[%s1035_s1 + $0xa8] ss:$28 sps:$4 sm:$0xff]   ;;  %v711_v21 = vld [vmem:[%s1035_s1 + $0xf4] ss:$28 sps:$4 sm:$0xff]   ;;  %v715_v24 = vld [vmem:[%s1035_s1 + $0x11c] ss:$28 sps:$4 sm:$0xff]  }
   0x8   :  { %v21_v18 = vld [vmem:[%s1034_s0 + $0x28] sm:$0xff]  ;;  %v719_v26 = vld [vmem:[%s1035_s1 + $0x118] ss:$28 sps:$4 sm:$0xff]   ;;  %v723_v29 = vld [vmem:[%s1035_s1 + $0x164] ss:$28 sps:$4 sm:$0xff]  }
   0x9   :  { %441 = vmatprep.mubr.bf16.mxu1 %v24_v15  ;;  %v28_v20 = vpack.c.bf16 %v21_v18, %v21_v18  ;;  %v714_v23 = vld [vmem:[%s1035_s1 + $0xf0] ss:$28 sps:$4 sm:$0xff]   ;;  %v720_v27 = vld [vmem:[%s1035_s1 + $0x128] ss:$28 sps:$4 sm:$0xff]  }
   0xa   :  { %v717_v25 = vld [vmem:[%s1035_s1 + $0x12c] ss:$28 sps:$4 sm:$0xff]   ;;  %v721_v28 = vld [vmem:[%s1035_s1 + $0x154] ss:$28 sps:$4 sm:$0xff]  }
   0xb   :  { %412 = vmatpush1.bf16.xpose.msra.mxu1 %v695_v6  ;;  %492 = vmatpush1.bf16.xpose.msra.mxu0 %v696_v7 }
   0xc   :  { %413 = vmatprep.subr.bf16.mxu1 %v697_v8  ;;  %493 = vmatprep.subr.bf16.mxu0 %v699_v9 }
   0xd   :  { %521 = vmatprep.mubr.bf16.mxu0 %v28_v20 }
  0x13   :  { %414 = vmatpush1.bf16.xpose.msra.mxu1 %v701_v10  ;;  %494 = vmatpush1.bf16.xpose.msra.mxu0 %v702_v11 }
  0x14   :  { %415 = vmatprep.subr.bf16.mxu1 %v703_v12  ;;  %495 = vmatprep.subr.bf16.mxu0 %v705_v13 }
  0x1b   :  { %416 = vmatpush1.bf16.xpose.msra.mxu1 %v707_v16  ;;  %496 = vmatpush1.bf16.xpose.msra.mxu0 %v708_v17 }
  0x1c   :  { %417 = vmatprep.subr.bf16.mxu1 %v709_v19  ;;  %497 = vmatprep.subr.bf16.mxu0 %v711_v21 }
  0x23   :  { %418 = vmatpush1.bf16.xpose.msra.mxu1 %v713_v22  ;;  %498 = vmatpush1.bf16.xpose.msra.mxu0 %v714_v23 }
  0x24   :  { %419 = vmatprep.subr.bf16.mxu1 %v715_v24  ;;  %499 = vmatprep.subr.bf16.mxu0 %v717_v25 }
  0x25   :  { %8 = vsyncpa [#allocation3], 0  ;;  %v725_v30 = vld [vmem:[%s1035_s1 + $0x150] ss:$28 sps:$4 sm:$0xff]   ;;  %v726_v31 = vld [vmem:[%s1035_s1 + $0x160] ss:$28 sps:$4 sm:$0xff]  }
  0x26   :  { %v727_v32 = vld [vmem:[%s1035_s1 + $0x18c] ss:$28 sps:$4 sm:$0xff]   ;;  %v729_v33 = vld [vmem:[%s1035_s1 + $0x19c] ss:$28 sps:$4 sm:$0xff]   ;;  %v16_v37 = vld [vmem:[%s1034_s0] sm:$0xff]  ;;  %v789_v39 = vmov 0.0  }
  0x27   :  { %v731_v34 = vld [vmem:[%s1035_s1 + $0x188] ss:$28 sps:$4 sm:$0xff]   ;;  %v732_v35 = vld [vmem:[%s1035_s1 + $0x198] ss:$28 sps:$4 sm:$0xff]   ;;  %vm381_vm0 = vcmask 130048   ;;  %v23_v41 = vpack.c.bf16 %v16_v37, %v16_v37  ;;  %vm790_vm1 = vmmov 0  }
  0x28   :  { %v735_v36 = vld [vmem:[%s1035_s1 + $0xc] ss:$28 sps:$4 sm:$0xff]   ;;  %v20_v38 = vld [vmem:[%s1034_s0 + $0x20] sm:$0xff]  ;;  %v736_v40 = vld [vmem:[%s1035_s1 + $0x18] ss:$28 sps:$4 sm:$0xff]  }
  0x29   :  { %v27_v42 = vpack.c.bf16 %v20_v38, %v20_v38  ;;  %v19_v43 = vld [vmem:[%s1034_s0 + $0x18] sm:$0xff]  ;;  %v733_v44 = vld [vmem:[%s1035_s1 + $0x8] ss:$28 sps:$4 sm:$0xff]   ;;  %v386_v45 = vsel %vm381_vm0, %v736_v40, 0  ;;  %v740_v48 = vld [vmem:[%s1035_s1 + $0x50] ss:$28 sps:$4 sm:$0xff]  }
  0x2a   :  { %v739_v46 = vld [vmem:[%s1035_s1 + $0x44] ss:$28 sps:$4 sm:$0xff]   ;;  %v26_v47 = vpack.c.bf16 %v19_v43, %v19_v43  ;;  %v389_v50 = vsel %vm381_vm0, %v740_v48, 0  ;;  %v743_v51 = vld [vmem:[%s1035_s1 + $0x7c] ss:$28 sps:$4 sm:$0xff]   ;;  %v18_v11 = vld [vmem:[%s1034_s0 + $0x10] sm:$0xff] }
  0x2b   :  { %420 = vmatpush1.bf16.xpose.msra.mxu1 %v719_v26  ;;  %500 = vmatpush1.bf16.xpose.msra.mxu0 %v720_v27  ;;  %v737_v49 = vld [vmem:[%s1035_s1 + $0x40] ss:$28 sps:$4 sm:$0xff]   ;;  %v744_v52 = vld [vmem:[%s1035_s1 + $0x88] ss:$28 sps:$4 sm:$0xff]   ;;  %v741_v53 = vld [vmem:[%s1035_s1 + $0x78] ss:$28 sps:$4 sm:$0xff]   ;;  %v25_v13 = vpack.c.bf16 %v18_v11, %v18_v11 }
  0x2c   :  { %421 = vmatprep.subr.bf16.mxu1 %v721_v28  ;;  %501 = vmatprep.subr.bf16.mxu0 %v723_v29  ;;  %v392_v54 = vsel %vm381_vm0, %v744_v52, 0  ;;  %v747_v55 = vld [vmem:[%s1035_s1 + $0xb4] ss:$28 sps:$4 sm:$0xff]   ;;  %v748_v56 = vld [vmem:[%s1035_s1 + $0xc0] ss:$28 sps:$4 sm:$0xff]  }
  0x2d   :  { %v745_v57 = vld [vmem:[%s1035_s1 + $0xb0] ss:$28 sps:$4 sm:$0xff]   ;;  %v395_v58 = vsel %vm381_vm0, %v748_v56, 0  ;;  %v752_v60 = vld [vmem:[%s1035_s1 + $0xf8] ss:$28 sps:$4 sm:$0xff]  }
  0x2e   :  { %v751_v59 = vld [vmem:[%s1035_s1 + $0xec] ss:$28 sps:$4 sm:$0xff]   ;;  %v398_v62 = vsel %vm381_vm0, %v752_v60, 0  ;;  %v755_v63 = vld [vmem:[%s1035_s1 + $0x124] ss:$28 sps:$4 sm:$0xff]   ;;  %v22_v12 = vld [vmem:[%s1034_s0 + $0x30] sm:$0xff] }
  0x2f   :  { %v749_v61 = vld [vmem:[%s1035_s1 + $0xe8] ss:$28 sps:$4 sm:$0xff]   ;;  %v756_v0 = vld [vmem:[%s1035_s1 + $0x130] ss:$28 sps:$4 sm:$0xff]   ;;  %v753_v1 = vld [vmem:[%s1035_s1 + $0x120] ss:$28 sps:$4 sm:$0xff]   ;;  %v29_v14 = vpack.c.bf16 %v22_v12, %v22_v12 }
  0x30   :  { %v401_v2 = vsel %vm381_vm0, %v756_v0, 0  ;;  %v759_v3 = vld [vmem:[%s1035_s1 + $0x15c] ss:$28 sps:$4 sm:$0xff]   ;;  %v760_v4 = vld [vmem:[%s1035_s1 + $0x168] ss:$28 sps:$4 sm:$0xff]  }
  0x31   :  { %v757_v5 = vld [vmem:[%s1035_s1 + $0x158] ss:$28 sps:$4 sm:$0xff]   ;;  %v404_v6 = vsel %vm381_vm0, %v760_v4, 0  ;;  %v764_v8 = vld [vmem:[%s1035_s1 + $0x1a0] ss:$28 sps:$4 sm:$0xff]  }
  0x32   :  { %v763_v7 = vld [vmem:[%s1035_s1 + $0x194] ss:$28 sps:$4 sm:$0xff]   ;;  %v407_v10 = vsel %vm381_vm0, %v764_v8, 0  ;;  %v585_v15 = vld [vmem:[%s1036_s2] ss:$0 sm:$0xff] }
  0x33   :  { %422 = vmatpush1.bf16.xpose.msra.mxu1 %v725_v30  ;;  %502 = vmatpush1.bf16.xpose.msra.mxu0 %v726_v31  ;;  %v761_v9 = vld [vmem:[%s1035_s1 + $0x190] ss:$28 sps:$4 sm:$0xff]   ;;  %s791_s1 = smov [#allocation2]  }
  0x34   :  { %423 = vmatprep.subr.bf16.mxu1 %v727_v32  ;;  %503 = vmatprep.subr.bf16.mxu0 %v729_v33  ;;  %s577_s5 = sshll.u32 %s791_s1, 4  ;;  %s578_s5 = int_to_ptr.vmem [resolvable:$true] %s577_s5 }
  0x35   :  { %s765_s0 = scalar_lea.vmem %s578_s5, 64  ;;  %p770_p1 = scmp.lt.s32.totalorder %s578_s5, %s578_s5 }
  0x36   :  { %p766_p0 = scmp.ne.s32.totalorder %s578_s5, %s765_s0  ;;  %p771_p2 = scmp.lt.s32.totalorder %s765_s0, %s765_s0 }
  0x38   :  { %p772_p3 = por %p771_p2, %p770_p1 }
  0x3a   :  { %p773_p4 = pnand %p772_p3, %p766_p0 }
  0x3b   :  { %424 = vmatpush1.bf16.xpose.msra.mxu1 %v731_v34  ;;  %504 = vmatpush1.bf16.xpose.msra.mxu0 %v732_v35 }
  0x3c   :  { %449 = vmatprep.subr.bf16.mxu1 %v735_v36  ;;  %652 = vmatprep.subr.bf16.mxu0 %v789_v39 }
  0x42   :  { %442 = vmatmul.mubr.bf16.vlgmr.msra.gmra.mrb[0].mxu1 %v23_v41  ;;  %522 = vmatmul.mubr.bf16.vlgmr.msra.gmra.mrb[0].mxu0 %v27_v42 }
  0x43   :  { %450 = vmatpush1.bf16.xpose.msra.mxu1 %v733_v44  ;;  %653 = vmatpush3.bf16.xpose.msra.mxu0 %v386_v45 }
  0x44   :  { %451 = vmatprep.subr.bf16.mxu1 %v739_v46  ;;  %654 = vmatprep.subr.bf16.mxu0 %v789_v39 }
  0x45   :  { %481 = vmatprep.mubr.bf16.mxu1 %v26_v47  ;;  %668 = vmatprep.mubr.msk.bf16.mxu0 %vm790_vm1, %v789_v39 }
  0x4b   :  { %452 = vmatpush1.bf16.xpose.msra.mxu1 %v737_v49  ;;  %655 = vmatpush3.bf16.xpose.msra.mxu0 %v389_v50 }
  0x4c   :  { %453 = vmatprep.subr.bf16.mxu1 %v743_v51  ;;  %656 = vmatprep.subr.bf16.mxu0 %v789_v39 }
  0x53   :  { %454 = vmatpush1.bf16.xpose.msra.mxu1 %v741_v53  ;;  %657 = vmatpush3.bf16.xpose.msra.mxu0 %v392_v54 }
  0x54   :  { %455 = vmatprep.subr.bf16.mxu1 %v747_v55  ;;  %658 = vmatprep.subr.bf16.mxu0 %v789_v39 }
  0x5b   :  { %456 = vmatpush1.bf16.xpose.msra.mxu1 %v745_v57  ;;  %659 = vmatpush3.bf16.xpose.msra.mxu0 %v395_v58 }
  0x5c   :  { %457 = vmatprep.subr.bf16.mxu1 %v751_v59  ;;  %660 = vmatprep.subr.bf16.mxu0 %v789_v39 }
  0x63   :  { %458 = vmatpush1.bf16.xpose.msra.mxu1 %v749_v61  ;;  %661 = vmatpush3.bf16.xpose.msra.mxu0 %v398_v62 }
  0x64   :  { %459 = vmatprep.subr.bf16.mxu1 %v755_v63  ;;  %662 = vmatprep.subr.bf16.mxu0 %v789_v39 }
  0x6b   :  { %460 = vmatpush1.bf16.xpose.msra.mxu1 %v753_v1  ;;  %663 = vmatpush3.bf16.xpose.msra.mxu0 %v401_v2 }
  0x6c   :  { %461 = vmatprep.subr.bf16.mxu1 %v759_v3  ;;  %664 = vmatprep.subr.bf16.mxu0 %v789_v39 }
  0x73   :  { %462 = vmatpush1.bf16.xpose.msra.mxu1 %v757_v5  ;;  %665 = vmatpush3.bf16.xpose.msra.mxu0 %v404_v6 }
  0x74   :  { %463 = vmatprep.subr.bf16.mxu1 %v763_v7  ;;  %666 = vmatprep.subr.bf16.mxu0 %v789_v39 }
  0x7b   :  { %464 = vmatpush1.bf16.xpose.msra.mxu1 %v761_v9  ;;  %667 = vmatpush3.bf16.xpose.msra.mxu0 %v407_v10 }
  0x82   :  { %482 = vmatmul.mubr.bf16.vlgmr.msra.gmra.mrb[0].mxu1 %v25_v13  ;;  %669 = vmatmul.mubr.msk.bf16.vlgmr.msra.gmra.mrb[0].mxu0 %vm381_vm0, %v29_v14 }
 0x155   :  { %v483_v16 = vpop.f32.mrb[0].mxu1  ;;  %v563_v17 = vpop.f32.mrb[0].mxu0 }
 0x156   :  { %v672_v18 = vadd.f32 %v585_v15, %v483_v16  ;;  %v485_v19 = vpop.f32.mrb[1].mxu1  ;;  %v670_v20 = vpop.f32.mrb[1].mxu0 }
 0x157   :  { %v486_v21 = vpop.f32.mrb[2].mxu1  ;;  %v566_v22 = vpop.f32.mrb[2].mxu0 }
 0x158   :  { %v673_v23 = vadd.f32 %v672_v18, %v563_v17  ;;  %v487_v24 = vpop.f32.mrb[3].mxu1  ;;  %v671_v25 = vpop.f32.mrb[3].mxu0 }
 0x15a   :  { %v569_v26 = vpack.c.bf16 %v673_v23, %v673_v23 }
 0x15c   :  { %570 = vst [vmem:[#allocation2] sm:$0xf] %v569_v26 }
 0x15d   :  { %776 = shalt.err (!%p773_p4)
}
 0x15e   :  { %s777_s7 = scalar_lea.hbm %s1037_s3, 64 }
 0x15f   :  { %p778_p5 = scmp.ne.s32.totalorder %s1037_s3, %s777_s7  ;;  %p781_p6 = scmp.lt.u32.totalorder %s777_s7, %s1037_s3 }
 0x161   :  { %p783_p7 = pnand %p781_p6, %p778_p5 }
 0x163   :  { %786 = shalt.err (!%p783_p7)
}
 0x164   :  { %580 = dma.vmem_to_hbm [thread:$0]  %s578_s5, 64, %s1037_s3, [#allocation3]  }
 0x165   :  { %787 = dma.done.wait [#allocation3], 64  }
 0x166   :  { %788 = vsyncadd [#allocation3], 4294967232 }
 0x167   :  { %584 = vsyncpa [#allocation3], 1 }

</bundles_post_ra>
